<compile_context>
chip_gen: v7x
topology: tpu7x:2x2x1
jax: 0.10.0
libtpu: 0.0.40
codegen_flags: <defaults>
</compile_context>

<pallas_src>
import functools

import jax
import jax.numpy as jnp
from jax.experimental import pallas as pl
from jax.experimental.pallas import tpu as pltpu


def _ceil128(n):
    return ((n + 127) // 128) * 128


def _neighbor_cat(x2, seg_len):
    """Build the k=3 / pad=1 im2col operand: [prev_row | row | next_row].

    x2: (rows, C) with rows = tb * seg_len, rows ordered (batch-major, position-minor).
    Rows shifted across a batch boundary are zeroed (== Conv1d zero padding).
    Returns (rows, 3*C).
    """
    rows = x2.shape[0]
    pos = jax.lax.broadcasted_iota(jnp.int32, x2.shape, 0)
    if seg_len & (seg_len - 1) == 0:          # power of two: cheap bitwise-and
        l_idx = pos & (seg_len - 1)
    else:
        l_idx = pos % seg_len
    zero = jnp.zeros_like(x2)
    prev = jnp.where(l_idx > 0, pltpu.roll(x2, shift=1, axis=0), zero)
    nxt = jnp.where(l_idx < seg_len - 1, pltpu.roll(x2, shift=rows - 1, axis=0), zero)
    return jnp.concatenate([prev, x2, nxt], axis=-1)


def _cnn_kernel(x_ref, w1_ref, b1_ref, w2_ref, b2_ref,
                wf1_ref, bf1_ref, wf2_ref, bf2_ref,
                out_ref, h1_ref, h2_ref, p2_ref, *, tb, L):
    """One batch-block forward pass, fully in VMEM.

    x_ref  : (tb*L, Cin)           folded (batch, position) rows, channels last
    w1_ref : (3*Cin, H)   b1_ref: (1, H)        (taps stacked along K)
    w2_ref : (3*H, 2H)    b2_ref: (1, 2H)
    wf1_ref: (2H*L/4, 4H) bf1_ref: (1, 4H)      (rows permuted position-major)
    wf2_ref: (4H, OP)     bf2_ref: (1, OP)      (output lane-padded to OP = ceil128(O))
    out_ref: (tb, OP)
    h1_ref : (tb*L,   H) f32 scratch (conv1 pre-pool)
    h2_ref : (tb*L/2, 2H) f32 scratch (conv2 pre-pool)
    p2_ref : (tb*L/4, 2H) f32 scratch (pooled conv2 output, used by fc1)
    """
    L1, L2 = L // 2, L // 4
    H2 = w2_ref.shape[1]
    H4 = bf1_ref.shape[1]
    cdt = w1_ref.dtype

    x = x_ref[...]                                                  # (tb*L, Cin)

    # ---- conv1 (k=3, pad=1) + ReLU : single matmul, K = 3*Cin --------------
    a1 = jnp.dot(_neighbor_cat(x, L).astype(cdt), w1_ref[...],
                 preferred_element_type=jnp.float32) + b1_ref[...]
    h1_ref[...] = jnp.maximum(a1, 0.0)                              # f32 scratch

    # ---- maxpool(2,2): max of even/odd sublane-strided loads ---------------
    rows1 = tb * L1
    p1 = jnp.maximum(h1_ref[pl.ds(0, rows1, stride=2), :],
                     h1_ref[pl.ds(1, rows1, stride=2), :])          # (tb*L1, H) f32

    # ---- conv2 (k=3, pad=1) + ReLU : single matmul, K = 3*H ----------------
    a2 = jnp.dot(_neighbor_cat(p1, L1).astype(cdt), w2_ref[...],
                 preferred_element_type=jnp.float32) + b2_ref[...]
    h2_ref[...] = jnp.maximum(a2, 0.0)                              # f32 scratch

    # ---- maxpool(2,2) -> p2 scratch ----------------------------------------
    rows2 = tb * L2
    p2_ref[...] = jnp.maximum(h2_ref[pl.ds(0, rows2, stride=2), :],
                              h2_ref[pl.ds(1, rows2, stride=2), :])  # (tb*L2, 2H)

    # ---- fc1 + ReLU without the sublane->lane flatten relayout -------------
    # Row b*L2 + l of p2 holds position l of sample b; wf1 rows are pre-permuted
    # to position-major order, so:
    #   f1[b] = bf1 + sum_l p2[b*L2 + l, :] @ wf1[l*H2 : (l+1)*H2, :]
    f1 = jnp.zeros((tb, H4), jnp.float32)
    for l in range(L2):                                   # static, small, unrolled
        rows_l = p2_ref[pl.ds(l, tb, stride=L2), :]       # (tb, 2H): sample-major
        f1 = f1 + jnp.dot(rows_l.astype(cdt), wf1_ref[pl.ds(l * H2, H2), :],
                          preferred_element_type=jnp.float32)
    f1 = jnp.maximum(f1 + bf1_ref[...], 0.0)

    # ---- fc2 (lane-dense padded output) -------------------------------------
    out = jnp.dot(f1.astype(cdt), wf2_ref[...],
                  preferred_element_type=jnp.float32) + bf2_ref[...]
    out_ref[...] = out.astype(out_ref.dtype)


def prepare_params(torch_params, *, seq_len, compute_dtype=jnp.float32):
    """ONE-TIME conversion of PyTorch-layout params to kernel layout.

    Call outside the per-step path (model-load time). compute_dtype=jnp.bfloat16
    is an opt-in fast-MXU path for v6e/v7x (f32 accumulation & f32 activations
    kept; only matmul operands/weights go bf16). Keep f32 on v5e.
    """
    H, Cin = torch_params["conv1_w"].shape[0], torch_params["conv1_w"].shape[1]
    H2 = torch_params["conv2_w"].shape[0]
    L2 = (seq_len // 2) // 2
    F = H2 * L2
    O = torch_params["fc2_w"].shape[0]
    OP = _ceil128(O)                                                # lane-dense output width

    # conv weights: (Cout, Cin, 3) -> (3, Cin, Cout) -> (3*Cin, Cout) (taps stacked on K)
    w1 = jnp.transpose(torch_params["conv1_w"], (2, 1, 0)).reshape(3 * Cin, H)
    w2 = jnp.transpose(torch_params["conv2_w"], (2, 1, 0)).reshape(3 * H, H2)
    # fc1: PyTorch flatten index = c*L2 + l ; kernel flatten index = l*H2 + c.
    wf1 = torch_params["fc1_w"].T                                    # (F, 4H), rows c*L2+l
    wf1 = wf1.reshape(H2, L2, -1).transpose(1, 0, 2).reshape(F, -1)  # rows l*H2+c
    # fc2: pad output dim to OP so the final store is an unmasked lane-dense vst.
    wf2 = jnp.pad(torch_params["fc2_w"].T, ((0, 0), (0, OP - O)))    # (4H, OP)
    bf2 = jnp.pad(torch_params["fc2_b"], (0, OP - O)).reshape(1, OP)

    return {
        "w1": w1.astype(compute_dtype),
        "b1": torch_params["conv1_b"].reshape(1, H).astype(jnp.float32),
        "w2": w2.astype(compute_dtype),
        "b2": torch_params["conv2_b"].reshape(1, H2).astype(jnp.float32),
        "wf1": wf1.astype(compute_dtype),
        "bf1": torch_params["fc1_b"].reshape(1, -1).astype(jnp.float32),
        "wf2": wf2.astype(compute_dtype),
        "bf2": bf2.astype(jnp.float32),
    }


@functools.partial(jax.jit, static_argnames=("output_size", "batch_block"))
def cnn_forward(x, kparams, *, output_size, batch_block=256):
    """x: (B, seq_len, input_size); kparams: output of prepare_params().

    batch_block: rows-per-grid-step control. Default 256 targets tb*L in the
    1k-4k range (amortizes the ~0.35us/step grid overhead). On v7x keep the
    lane-padded VMEM estimate (see below) under ~40-48 MiB and B//tb >= 2 so
    the ("parallel",) batch axis actually splits across both TensorCores.
    """
    B, L, Cin = x.shape
    assert L % 4 == 0, "seq_len must be divisible by 4 (two k=2/s=2 pools)"
    tb = min(batch_block, B)
    if tb < B:
        assert B % tb == 0, "batch must be divisible by the batch block"
        assert tb % 8 == 0, ("partial batch blocks must be a multiple of 8 "
                             "(TPU (8,128) block-shape divisibility)")
    L1, L2 = L // 2, L // 4
    H = kparams["w1"].shape[1]
    H2 = kparams["w2"].shape[1]
    H4 = kparams["bf1"].shape[1]
    OP = kparams["wf2"].shape[1]
    in_bytes = jnp.dtype(x.dtype).itemsize

    x2 = x.reshape(B * L, Cin)                       # fold batch into rows; no cast here

    # Lane-padding-aware VMEM estimate (double-buffered in/out + f32 scratch).
    est = (2 * tb * L * _ceil128(Cin) * in_bytes      # x block (double-buffered)
           + tb * L * _ceil128(H) * 4                 # h1 scratch
           + tb * L1 * _ceil128(H2) * 4               # h2 scratch
           + tb * L2 * _ceil128(H2) * 4               # p2 scratch
           + 2 * tb * OP * 4)                         # out block (double-buffered)
    vmem_limit = int(min(100 * 1024 * 1024, max(32 * 1024 * 1024, 2 * est)))

    # Advisory cost for XLA's scheduler (kernel is overhead/VPU-bound, not MXU-bound).
    flops = 2 * B * (L * (3 * Cin) * H + L1 * (3 * H) * H2 + L2 * H2 * H4 + H4 * OP)
    w_bytes = sum(int(v.size) * jnp.dtype(v.dtype).itemsize for v in kparams.values())
    cost = pl.CostEstimate(flops=flops, transcendentals=0,
                           bytes_accessed=int(x.size) * in_bytes + B * OP * 4 + w_bytes)

    def full_spec(a):
        return pl.BlockSpec(a.shape, lambda i, _nd=a.ndim: (0,) * _nd)

    kernel = functools.partial(_cnn_kernel, tb=tb, L=L)
    out = pl.pallas_call(
        kernel,
        out_shape=jax.ShapeDtypeStruct((B, OP), jnp.float32),
        grid=(B // tb,),
        in_specs=[
            pl.BlockSpec((tb * L, Cin), lambda i: (i, 0)),
            full_spec(kparams["w1"]), full_spec(kparams["b1"]),
            full_spec(kparams["w2"]), full_spec(kparams["b2"]),
            full_spec(kparams["wf1"]), full_spec(kparams["bf1"]),
            full_spec(kparams["wf2"]), full_spec(kparams["bf2"]),
        ],
        out_specs=pl.BlockSpec((tb, OP), lambda i: (i, 0)),
        scratch_shapes=[
            pltpu.VMEM((tb * L, H), jnp.float32),     # conv1 output (pre-pool), f32
            pltpu.VMEM((tb * L1, H2), jnp.float32),   # conv2 output (pre-pool), f32
            pltpu.VMEM((tb * L2, H2), jnp.float32),   # pooled conv2 output, f32
        ],
        compiler_params=pltpu.CompilerParams(
            dimension_semantics=("parallel",),        # shard batch blocks across TCs (v7x)
            vmem_limit_bytes=vmem_limit,
        ),
        cost_estimate=cost,
    )(x2, kparams["w1"], kparams["b1"], kparams["w2"], kparams["b2"],
      kparams["wf1"], kparams["bf1"], kparams["wf2"], kparams["bf2"])
    return out[:, :output_size]


def _torch_style_reference(x, params):
    """Pure-JAX replica of the PyTorch forward (NCL conv, channel-major flatten)."""
    xt = jnp.transpose(x, (0, 2, 1))                              # (B, Cin, L)

    def conv1d(xc, w, b):                                         # w: (Cout, Cin, 3)
        Lc = xc.shape[2]
        xp = jnp.pad(xc, ((0, 0), (0, 0), (1, 1)))
        out = sum(jnp.einsum("bcl,oc->bol", xp[:, :, k:k + Lc], w[:, :, k])
                  for k in range(3))
        return out + b[None, :, None]

    def pool(h):
        B_, C_, L_ = h.shape
        return jnp.max(h.reshape(B_, C_, L_ // 2, 2), axis=3)

    h = pool(jnp.maximum(conv1d(xt, params["conv1_w"], params["conv1_b"]), 0.0))
    h = pool(jnp.maximum(conv1d(h, params["conv2_w"], params["conv2_b"]), 0.0))
    flat = h.reshape(h.shape[0], -1)                              # channel-major flatten
    f1 = jnp.maximum(flat @ params["fc1_w"].T + params["fc1_b"], 0.0)
    return f1 @ params["fc2_w"].T + params["fc2_b"]


if __name__ == "__main__":
    batch, seq_len, input_size = 2, 16, 4
    hidden_size, output_size = 32, 4
    L2 = (seq_len // 2) // 2
    flat_dim = (hidden_size * 2) * L2                             # forward()-implied fc1 in_features

    key = jax.random.PRNGKey(0)
    keys = jax.random.split(key, 10)
    s = 0.1
    params = {
        "conv1_w": s * jax.random.normal(keys[0], (hidden_size, input_size, 3), jnp.float32),
        "conv1_b": s * jax.random.normal(keys[1], (hidden_size,), jnp.float32),
        "conv2_w": s * jax.random.normal(keys[2], (hidden_size * 2, hidden_size, 3), jnp.float32),
        "conv2_b": s * jax.random.normal(keys[3], (hidden_size * 2,), jnp.float32),
        "fc1_w": s * jax.random.normal(keys[4], (hidden_size * 4, flat_dim), jnp.float32),
        "fc1_b": s * jax.random.normal(keys[5], (hidden_size * 4,), jnp.float32),
        "fc2_w": s * jax.random.normal(keys[6], (output_size, hidden_size * 4), jnp.float32),
        "fc2_b": s * jax.random.normal(keys[7], (output_size,), jnp.float32),
    }
    x = jax.random.normal(keys[8], (batch, seq_len, input_size), jnp.float32)

    # One-time weight-layout conversion (kept out of the jitted per-call path).
    kparams = jax.tree_util.tree_map(jax.block_until_ready,
                                     prepare_params(params, seq_len=seq_len))

    # Small batch: single grid step (block == full batch).
    out = jax.block_until_ready(cnn_forward(x, kparams, output_size=output_size))
    ref = jax.block_until_ready(_torch_style_reference(x, params))
    assert out.shape == (batch, output_size)
    assert bool(jnp.all(jnp.isfinite(out)))
    assert bool(jnp.allclose(out, ref, atol=1e-4, rtol=1e-4)), "mismatch vs reference (B=2)"

    # Larger batch with tb < B: exercises the multi-step grid + megacore-parallel path.
    xb = jax.random.normal(keys[9], (32, seq_len, input_size), jnp.float32)
    outb = jax.block_until_ready(
        cnn_forward(xb, kparams, output_size=output_size, batch_block=8))
    refb = jax.block_until_ready(_torch_style_reference(xb, params))
    assert outb.shape == (32, output_size)
    assert bool(jnp.allclose(outb, refb, atol=1e-4, rtol=1e-4)), "mismatch vs reference (B=32)"

    print("KERNEL_OK")
</pallas_src>

<mosaic_0001>
module attributes {stable_mosaic.version = 11 : i64} {
  func.func @_cnn_kernel(%arg0: i32, %arg1: memref<32x4xf32, #tpu.memory_space<vmem>>, %arg2: memref<12x32xf32, #tpu.memory_space<vmem>>, %arg3: memref<1x32xf32, #tpu.memory_space<vmem>>, %arg4: memref<96x64xf32, #tpu.memory_space<vmem>>, %arg5: memref<1x64xf32, #tpu.memory_space<vmem>>, %arg6: memref<256x128xf32, #tpu.memory_space<vmem>>, %arg7: memref<1x128xf32, #tpu.memory_space<vmem>>, %arg8: memref<128x128xf32, #tpu.memory_space<vmem>>, %arg9: memref<1x128xf32, #tpu.memory_space<vmem>>, %arg10: memref<2x128xf32, #tpu.memory_space<vmem>>, %arg11: memref<32x32xf32, #tpu.memory_space<vmem>>, %arg12: memref<16x64xf32, #tpu.memory_space<vmem>>, %arg13: memref<8x64xf32, #tpu.memory_space<vmem>>) attributes {dimension_semantics = [#tpu.dimension_semantics<parallel>], iteration_bounds = array<i64: 1>, scalar_prefetch = 0 : i64, scratch_operands = 3 : i64, tpu.core_type = #tpu.core_type<tc>, window_params = [{transform_indices = @transform_0, window_bounds = array<i64: 32, 4>}, {pipeline_mode = #tpu.pipeline_mode<synchronous>, transform_indices = @transform_1, window_bounds = array<i64: 12, 32>}, {pipeline_mode = #tpu.pipeline_mode<synchronous>, transform_indices = @transform_2, window_bounds = array<i64: 1, 32>}, {pipeline_mode = #tpu.pipeline_mode<synchronous>, transform_indices = @transform_3, window_bounds = array<i64: 96, 64>}, {pipeline_mode = #tpu.pipeline_mode<synchronous>, transform_indices = @transform_4, window_bounds = array<i64: 1, 64>}, {pipeline_mode = #tpu.pipeline_mode<synchronous>, transform_indices = @transform_5, window_bounds = array<i64: 256, 128>}, {pipeline_mode = #tpu.pipeline_mode<synchronous>, transform_indices = @transform_6, window_bounds = array<i64: 1, 128>}, {pipeline_mode = #tpu.pipeline_mode<synchronous>, transform_indices = @transform_7, window_bounds = array<i64: 128, 128>}, {pipeline_mode = #tpu.pipeline_mode<synchronous>, transform_indices = @transform_8, window_bounds = array<i64: 1, 128>}, {transform_indices = @transform_9, window_bounds = array<i64: 2, 128>}]} {
    %c0 = arith.constant 0 : index
    %c0_0 = arith.constant 0 : index
    %0 = vector.load %arg1[%c0, %c0_0] : memref<32x4xf32, #tpu.memory_space<vmem>>, vector<32x4xf32>
    %1 = tpu.iota {dimensions = array<i32: 0>} : vector<32x4xi32>
    %c15_i32 = arith.constant 15 : i32
    %2 = vector.broadcast %c15_i32 : i32 to vector<32x4xi32>
    %3 = arith.andi %1, %2 : vector<32x4xi32>
    %cst = arith.constant 0.000000e+00 : f32
    %4 = vector.broadcast %cst : f32 to vector<32x4xf32>
    %c0_i32 = arith.constant 0 : i32
    %5 = vector.broadcast %c0_i32 : i32 to vector<32x4xi32>
    %6 = arith.cmpi sgt, %3, %5 : vector<32x4xi32>
    %c1_i32 = arith.constant 1 : i32
    %7 = tpu.dynamic_rotate %0 by %c1_i32 dim 0 : vector<32x4xf32>, i32 -> vector<32x4xf32>
    %8 = arith.select %6, %7, %4 : vector<32x4xi1>, vector<32x4xf32>
    %c15_i32_1 = arith.constant 15 : i32
    %9 = vector.broadcast %c15_i32_1 : i32 to vector<32x4xi32>
    %10 = arith.cmpi slt, %3, %9 : vector<32x4xi32>
    %c31_i32 = arith.constant 31 : i32
    %11 = tpu.dynamic_rotate %0 by %c31_i32 dim 0 : vector<32x4xf32>, i32 -> vector<32x4xf32>
    %12 = arith.select %10, %11, %4 : vector<32x4xi1>, vector<32x4xf32>
    %13 = tpu.concatenate %8, %0, %12 in 1 : vector<32x4xf32>, vector<32x4xf32>, vector<32x4xf32> -> vector<32x12xf32>
    %c0_2 = arith.constant 0 : index
    %c0_3 = arith.constant 0 : index
    %14 = vector.load %arg2[%c0_2, %c0_3] : memref<12x32xf32, #tpu.memory_space<vmem>>, vector<12x32xf32>
    %cst_4 = arith.constant dense<0.000000e+00> : vector<32x32xf32>
    %15 = tpu.matmul %13, %14, %cst_4 {dimension_numbers = #tpu.dot_dimension_numbers<[1], [0], [0], [1], [0, 0, 1, 1], [], []>} : vector<32x12xf32>, vector<12x32xf32>, vector<32x32xf32> -> vector<32x32xf32>
    %c0_5 = arith.constant 0 : index
    %c0_6 = arith.constant 0 : index
    %16 = vector.load %arg3[%c0_5, %c0_6] : memref<1x32xf32, #tpu.memory_space<vmem>>, vector<1x32xf32>
    %17 = vector.broadcast %16 : vector<1x32xf32> to vector<32x32xf32>
    %18 = arith.addf %15, %17 : vector<32x32xf32>
    %cst_7 = arith.constant 0.000000e+00 : f32
    %19 = vector.broadcast %cst_7 : f32 to vector<32x32xf32>
    %20 = arith.maximumf %18, %19 : vector<32x32xf32>
    %c0_8 = arith.constant 0 : index
    %c0_9 = arith.constant 0 : index
    %21 = vector.load %arg11[%c0_8, %c0_9] : memref<32x32xf32, #tpu.memory_space<vmem>>, vector<32x32xf32>
    tpu.vector_store %arg11[%c0_8, %c0_9], %20 {strides = array<i32>} : memref<32x32xf32, #tpu.memory_space<vmem>>, vector<32x32xf32>,
    %c0_10 = arith.constant 0 : index
    %c0_11 = arith.constant 0 : index
    %22 = tpu.strided_load %arg11[%c0_10, %c0_11] {strides = array<i32: 2, 1>} : memref<32x32xf32, #tpu.memory_space<vmem>>, vector<16x32xf32>
    %c1 = arith.constant 1 : index
    %c0_12 = arith.constant 0 : index
    %23 = tpu.strided_load %arg11[%c1, %c0_12] {strides = array<i32: 2, 1>} : memref<32x32xf32, #tpu.memory_space<vmem>>, vector<16x32xf32>
    %24 = arith.maximumf %22, %23 : vector<16x32xf32>
    %25 = tpu.iota {dimensions = array<i32: 0>} : vector<16x32xi32>
    %c7_i32 = arith.constant 7 : i32
    %26 = vector.broadcast %c7_i32 : i32 to vector<16x32xi32>
    %27 = arith.andi %25, %26 : vector<16x32xi32>
    %cst_13 = arith.constant 0.000000e+00 : f32
    %28 = vector.broadcast %cst_13 : f32 to vector<16x32xf32>
    %c0_i32_14 = arith.constant 0 : i32
    %29 = vector.broadcast %c0_i32_14 : i32 to vector<16x32xi32>
    %30 = arith.cmpi sgt, %27, %29 : vector<16x32xi32>
    %c1_i32_15 = arith.constant 1 : i32
    %31 = tpu.dynamic_rotate %24 by %c1_i32_15 dim 0 : vector<16x32xf32>, i32 -> vector<16x32xf32>
    %32 = arith.select %30, %31, %28 : vector<16x32xi1>, vector<16x32xf32>
    %c7_i32_16 = arith.constant 7 : i32
    %33 = vector.broadcast %c7_i32_16 : i32 to vector<16x32xi32>
    %34 = arith.cmpi slt, %27, %33 : vector<16x32xi32>
    %c15_i32_17 = arith.constant 15 : i32
    %35 = tpu.dynamic_rotate %24 by %c15_i32_17 dim 0 : vector<16x32xf32>, i32 -> vector<16x32xf32>
    %36 = arith.select %34, %35, %28 : vector<16x32xi1>, vector<16x32xf32>
    %37 = tpu.concatenate %32, %24, %36 in 1 : vector<16x32xf32>, vector<16x32xf32>, vector<16x32xf32> -> vector<16x96xf32>
    %c0_18 = arith.constant 0 : index
    %c0_19 = arith.constant 0 : index
    %38 = vector.load %arg4[%c0_18, %c0_19] : memref<96x64xf32, #tpu.memory_space<vmem>>, vector<96x64xf32>
    %cst_20 = arith.constant dense<0.000000e+00> : vector<16x64xf32>
    %39 = tpu.matmul %37, %38, %cst_20 {dimension_numbers = #tpu.dot_dimension_numbers<[1], [0], [0], [1], [0, 0, 1, 1], [], []>} : vector<16x96xf32>, vector<96x64xf32>, vector<16x64xf32> -> vector<16x64xf32>
    %c0_21 = arith.constant 0 : index
    %c0_22 = arith.constant 0 : index
    %40 = vector.load %arg5[%c0_21, %c0_22] : memref<1x64xf32, #tpu.memory_space<vmem>>, vector<1x64xf32>
    %41 = vector.broadcast %40 : vector<1x64xf32> to vector<16x64xf32>
    %42 = arith.addf %39, %41 : vector<16x64xf32>
    %cst_23 = arith.constant 0.000000e+00 : f32
    %43 = vector.broadcast %cst_23 : f32 to vector<16x64xf32>
    %44 = arith.maximumf %42, %43 : vector<16x64xf32>
    %c0_24 = arith.constant 0 : index
    %c0_25 = arith.constant 0 : index
    %45 = vector.load %arg12[%c0_24, %c0_25] : memref<16x64xf32, #tpu.memory_space<vmem>>, vector<16x64xf32>
    tpu.vector_store %arg12[%c0_24, %c0_25], %44 {strides = array<i32>} : memref<16x64xf32, #tpu.memory_space<vmem>>, vector<16x64xf32>,
    %c0_26 = arith.constant 0 : index
    %c0_27 = arith.constant 0 : index
    %46 = tpu.strided_load %arg12[%c0_26, %c0_27] {strides = array<i32: 2, 1>} : memref<16x64xf32, #tpu.memory_space<vmem>>, vector<8x64xf32>
    %c1_28 = arith.constant 1 : index
    %c0_29 = arith.constant 0 : index
    %47 = tpu.strided_load %arg12[%c1_28, %c0_29] {strides = array<i32: 2, 1>} : memref<16x64xf32, #tpu.memory_space<vmem>>, vector<8x64xf32>
    %48 = arith.maximumf %46, %47 : vector<8x64xf32>
    %c0_30 = arith.constant 0 : index
    %c0_31 = arith.constant 0 : index
    %49 = vector.load %arg13[%c0_30, %c0_31] : memref<8x64xf32, #tpu.memory_space<vmem>>, vector<8x64xf32>
    tpu.vector_store %arg13[%c0_30, %c0_31], %48 {strides = array<i32>} : memref<8x64xf32, #tpu.memory_space<vmem>>, vector<8x64xf32>,
    %cst_32 = arith.constant 0.000000e+00 : f32
    %50 = vector.broadcast %cst_32 : f32 to vector<2x128xf32>
    %c0_33 = arith.constant 0 : index
    %c0_34 = arith.constant 0 : index
    %51 = tpu.strided_load %arg13[%c0_33, %c0_34] {strides = array<i32: 4, 1>} : memref<8x64xf32, #tpu.memory_space<vmem>>, vector<2x64xf32>
    %c0_35 = arith.constant 0 : index
    %c0_36 = arith.constant 0 : index
    %52 = vector.load %arg6[%c0_35, %c0_36] : memref<256x128xf32, #tpu.memory_space<vmem>>, vector<64x128xf32>
    %cst_37 = arith.constant dense<0.000000e+00> : vector<2x128xf32>
    %53 = tpu.matmul %51, %52, %cst_37 {dimension_numbers = #tpu.dot_dimension_numbers<[1], [0], [0], [1], [0, 0, 1, 1], [], []>} : vector<2x64xf32>, vector<64x128xf32>, vector<2x128xf32> -> vector<2x128xf32>
    %54 = arith.addf %50, %53 : vector<2x128xf32>
    %c1_38 = arith.constant 1 : index
    %c0_39 = arith.constant 0 : index
    %55 = tpu.strided_load %arg13[%c1_38, %c0_39] {strides = array<i32: 4, 1>} : memref<8x64xf32, #tpu.memory_space<vmem>>, vector<2x64xf32>
    %c64 = arith.constant 64 : index
    %c0_40 = arith.constant 0 : index
    %56 = vector.load %arg6[%c64, %c0_40] : memref<256x128xf32, #tpu.memory_space<vmem>>, vector<64x128xf32>
    %cst_41 = arith.constant dense<0.000000e+00> : vector<2x128xf32>
    %57 = tpu.matmul %55, %56, %cst_41 {dimension_numbers = #tpu.dot_dimension_numbers<[1], [0], [0], [1], [0, 0, 1, 1], [], []>} : vector<2x64xf32>, vector<64x128xf32>, vector<2x128xf32> -> vector<2x128xf32>
    %58 = arith.addf %54, %57 : vector<2x128xf32>
    %c2 = arith.constant 2 : index
    %c0_42 = arith.constant 0 : index
    %59 = tpu.strided_load %arg13[%c2, %c0_42] {strides = array<i32: 4, 1>} : memref<8x64xf32, #tpu.memory_space<vmem>>, vector<2x64xf32>
    %c128 = arith.constant 128 : index
    %c0_43 = arith.constant 0 : index
    %60 = vector.load %arg6[%c128, %c0_43] : memref<256x128xf32, #tpu.memory_space<vmem>>, vector<64x128xf32>
    %cst_44 = arith.constant dense<0.000000e+00> : vector<2x128xf32>
    %61 = tpu.matmul %59, %60, %cst_44 {dimension_numbers = #tpu.dot_dimension_numbers<[1], [0], [0], [1], [0, 0, 1, 1], [], []>} : vector<2x64xf32>, vector<64x128xf32>, vector<2x128xf32> -> vector<2x128xf32>
    %62 = arith.addf %58, %61 : vector<2x128xf32>
    %c3 = arith.constant 3 : index
    %c0_45 = arith.constant 0 : index
    %63 = tpu.strided_load %arg13[%c3, %c0_45] {strides = array<i32: 4, 1>} : memref<8x64xf32, #tpu.memory_space<vmem>>, vector<2x64xf32>
    %c192 = arith.constant 192 : index
    %c0_46 = arith.constant 0 : index
    %64 = vector.load %arg6[%c192, %c0_46] : memref<256x128xf32, #tpu.memory_space<vmem>>, vector<64x128xf32>
    %cst_47 = arith.constant dense<0.000000e+00> : vector<2x128xf32>
    %65 = tpu.matmul %63, %64, %cst_47 {dimension_numbers = #tpu.dot_dimension_numbers<[1], [0], [0], [1], [0, 0, 1, 1], [], []>} : vector<2x64xf32>, vector<64x128xf32>, vector<2x128xf32> -> vector<2x128xf32>
    %66 = arith.addf %62, %65 : vector<2x128xf32>
    %c0_48 = arith.constant 0 : index
    %c0_49 = arith.constant 0 : index
    %67 = vector.load %arg7[%c0_48, %c0_49] : memref<1x128xf32, #tpu.memory_space<vmem>>, vector<1x128xf32>
    %68 = vector.broadcast %67 : vector<1x128xf32> to vector<2x128xf32>
    %69 = arith.addf %66, %68 : vector<2x128xf32>
    %cst_50 = arith.constant 0.000000e+00 : f32
    %70 = vector.broadcast %cst_50 : f32 to vector<2x128xf32>
    %71 = arith.maximumf %69, %70 : vector<2x128xf32>
    %c0_51 = arith.constant 0 : index
    %c0_52 = arith.constant 0 : index
    %72 = vector.load %arg8[%c0_51, %c0_52] : memref<128x128xf32, #tpu.memory_space<vmem>>, vector<128x128xf32>
    %cst_53 = arith.constant dense<0.000000e+00> : vector<2x128xf32>
    %73 = tpu.matmul %71, %72, %cst_53 {dimension_numbers = #tpu.dot_dimension_numbers<[1], [0], [0], [1], [0, 0, 1, 1], [], []>} : vector<2x128xf32>, vector<128x128xf32>, vector<2x128xf32> -> vector<2x128xf32>
    %c0_54 = arith.constant 0 : index
    %c0_55 = arith.constant 0 : index
    %74 = vector.load %arg9[%c0_54, %c0_55] : memref<1x128xf32, #tpu.memory_space<vmem>>, vector<1x128xf32>
    %75 = vector.broadcast %74 : vector<1x128xf32> to vector<2x128xf32>
    %76 = arith.addf %73, %75 : vector<2x128xf32>
    %c0_56 = arith.constant 0 : index
    %c0_57 = arith.constant 0 : index
    %77 = vector.load %arg10[%c0_56, %c0_57] : memref<2x128xf32, #tpu.memory_space<vmem>>, vector<2x128xf32>
    tpu.vector_store %arg10[%c0_56, %c0_57], %76 {strides = array<i32>} : memref<2x128xf32, #tpu.memory_space<vmem>>, vector<2x128xf32>,
    return
  }
  func.func @transform_0(%arg0: i32) -> (i32, i32) {
    %c0_i32 = arith.constant 0 : i32
    %c0_i32_0 = arith.constant 0 : i32
    return %arg0, %c0_i32 : i32, i32
  }
  func.func @transform_1(%arg0: i32) -> (i32, i32) {
    %c0_i32 = arith.constant 0 : i32
    %c0_i32_0 = arith.constant 0 : i32
    %c0_i32_1 = arith.constant 0 : i32
    return %c0_i32, %c0_i32_0 : i32, i32
  }
  func.func @transform_2(%arg0: i32) -> (i32, i32) {
    %c0_i32 = arith.constant 0 : i32
    %c0_i32_0 = arith.constant 0 : i32
    %c0_i32_1 = arith.constant 0 : i32
    return %c0_i32, %c0_i32_0 : i32, i32
  }
  func.func @transform_3(%arg0: i32) -> (i32, i32) {
    %c0_i32 = arith.constant 0 : i32
    %c0_i32_0 = arith.constant 0 : i32
    %c0_i32_1 = arith.constant 0 : i32
    return %c0_i32, %c0_i32_0 : i32, i32
  }
  func.func @transform_4(%arg0: i32) -> (i32, i32) {
    %c0_i32 = arith.constant 0 : i32
    %c0_i32_0 = arith.constant 0 : i32
    %c0_i32_1 = arith.constant 0 : i32
    return %c0_i32, %c0_i32_0 : i32, i32
  }
  func.func @transform_5(%arg0: i32) -> (i32, i32) {
    %c0_i32 = arith.constant 0 : i32
    %c0_i32_0 = arith.constant 0 : i32
    %c0_i32_1 = arith.constant 0 : i32
    return %c0_i32, %c0_i32_0 : i32, i32
  }
  func.func @transform_6(%arg0: i32) -> (i32, i32) {
    %c0_i32 = arith.constant 0 : i32
    %c0_i32_0 = arith.constant 0 : i32
    %c0_i32_1 = arith.constant 0 : i32
    return %c0_i32, %c0_i32_0 : i32, i32
  }
  func.func @transform_7(%arg0: i32) -> (i32, i32) {
    %c0_i32 = arith.constant 0 : i32
    %c0_i32_0 = arith.constant 0 : i32
    %c0_i32_1 = arith.constant 0 : i32
    return %c0_i32, %c0_i32_0 : i32, i32
  }
  func.func @transform_8(%arg0: i32) -> (i32, i32) {
    %c0_i32 = arith.constant 0 : i32
    %c0_i32_0 = arith.constant 0 : i32
    %c0_i32_1 = arith.constant 0 : i32
    return %c0_i32, %c0_i32_0 : i32, i32
  }
  func.func @transform_9(%arg0: i32) -> (i32, i32) {
    %c0_i32 = arith.constant 0 : i32
    %c0_i32_0 = arith.constant 0 : i32
    return %arg0, %c0_i32 : i32, i32
  }
}

</mosaic_0001>

<bundles_post_ra>
// kernel: cnn_forward.1
= control target key start
LH: loop header
LB: loop body
LE: loop exit
PB: predicated region body
PF: predicated region fallthrough
CT: control target
= control target key end

     0   :  { %14 = vsyncpa [#allocation6], 0  ;;  %s1599_s0 = inlined_call_operand.vmem [shape: f32[32,4], index: 0, kind: input, shape index: {}]   ;;  %s1600_s1 = inlined_call_operand.vmem [shape: f32[12,32], index: 1, kind: input, shape index: {}]   ;;  %s1601_s2 = inlined_call_operand.vmem [shape: f32[1,32], index: 2, kind: input, shape index: {}]   ;;  %s1602_s3 = inlined_call_operand.vmem [shape: f32[96,64], index: 3, kind: input, shape index: {}]   ;;  %s1603_s4 = inlined_call_operand.vmem [shape: f32[1,64], index: 4, kind: input, shape index: {}]   ;;  %s1604_s5 = inlined_call_operand.hbm [shape: f32[256,128], index: 5, kind: input, shape index: {}]   ;;  %s1605_s6 = inlined_call_operand.vmem [shape: f32[1,128], index: 6, kind: input, shape index: {}]   ;;  %s1606_s7 = inlined_call_operand.vmem [shape: f32[128,128], index: 7, kind: input, shape index: {}]   ;;  %s1607_s8 = inlined_call_operand.vmem [shape: f32[1,128], index: 8, kind: input, shape index: {}]   ;;  %s1608_s9 = inlined_call_operand.hbm [shape: f32[2,128], index: 9, kind: output, shape index: {}]  }
   0x1   :  { %15 = vsyncpa [#allocation7], 0  ;;  %s1262_s30 = smov [#allocation5]   ;;  %s1214_s13 = scalar_lea.hbm %s1604_s5, 4096 }
   0x2   :  { %s31_s10 = sshll.u32 %s1262_s30, 4  ;;  %p1215_p0 = scmp.ne.s32.totalorder %s1604_s5, %s1214_s13  ;;  %s32_s10 = int_to_ptr.vmem [resolvable:$true] %s31_s10 }
   0x3   :  { %p1218_p1 = scmp.lt.u32.totalorder %s1214_s13, %s1604_s5 }
   0x5   :  { %p1220_p2 = pnand %p1218_p1, %p1215_p0 }
   0x7   :  { %1223 = shalt.err (!%p1220_p2)
}
   0x8   :  { %s1224_s18 = scalar_lea.vmem %s32_s10, 4096  ;;  %p1229_p4 = scmp.lt.s32.totalorder %s32_s10, %s32_s10 }
   0x9   :  { %p1225_p3 = scmp.ne.s32.totalorder %s32_s10, %s1224_s18  ;;  %p1230_p5 = scmp.lt.s32.totalorder %s1224_s18, %s1224_s18 }
   0xb   :  { %p1231_p6 = por %p1230_p5, %p1229_p4 }
   0xd   :  { %p1232_p7 = pnand %p1231_p6, %p1225_p3 }
   0xf   :  { %1235 = shalt.err (!%p1232_p7)
}
  0x10   :  { %s1263_s19 = smov 128   ;;  %s1264_s20 = smov 8  }
  0x11   :  { %37 = dma.hbm_to_vmem [thread:$0]  %s1604_s5, 4096, %s32_s10, [#allocation6], %s1263_s19, %s1263_s19, %s1264_s20  }
  0x12   :  { %1258 = dma.done.wait [#allocation6], 4096  }
  0x13   :  { %1259 = vsyncadd [#allocation6], 4294963200  ;;  %v51_v0 = vlaneseq  ;;  %v50_v5 = vld [vmem:[%s1599_s0 + $0x18] sm:$0xff]  ;;  %v47_v6 = vld [vmem:[%s1599_s0] sm:$0xff]  ;;  %vm158_vm1 = vcmask 1043456   ;;  %s1265_s28 = smov 4  }
  0x14   :  { %v48_v7 = vld [vmem:[%s1599_s0 + $0x8] sm:$0xff]  ;;  %104 = vrot.lane.b32.xlu1 %v50_v5, %s1265_s28  ;;  %v67_v8 = vrot.slane %v50_v5, 7  ;;  %98 = vrot.lane.b32.xlu0 %v47_v6, %s1265_s28  ;;  %v64_v9 = vrot.slane %v47_v6, 7  ;;  %v81_v10 = vrot.slane %v47_v6, 1  ;;  %v49_v11 = vld [vmem:[%s1599_s0 + $0x10] sm:$0xff]  ;;  %v84_v16 = vrot.slane %v50_v5, 1 }
  0x15   :  { %v1336_v1 = vshrl.u32 %v51_v0, 7  ;;  %v65_v12 = vrot.slane %v48_v7, 7  ;;  %v82_v13 = vrot.slane %v48_v7, 1  ;;  %v66_v14 = vrot.slane %v49_v11, 7  ;;  %v136_v20 = vld [vmem:[%s1600_s1] sm:$0xff]  ;;  %v305_v54 = vld [vmem:[%s1602_s3 + $0x8] sm:$0xff] }
  0x16   :  { %v83_v15 = vrot.slane %v49_v11, 1  ;;  %v137_v21 = vld [vmem:[%s1600_s1 + $0x8] sm:$0xf]  ;;  %vm1266_vm4 = vmmov 1   ;;  %vm126_vm8 = vcmask 31744   ;;  %vm131_vm9 = vcmask 64512  }
  0x17   :  { %v1339_v2 = vadd.s32 8, %v1336_v1  ;;  %v55_v4 = vadd.s32 24, %v1336_v1  ;;  %vm68_vm0 = vcmp.lt.s32.totalorder %v1336_v1, 1  ;;  %vm85_vm2 = vcmp.lt.s32.totalorder %v1336_v1, 7  ;;  %vm1102_vm5 = vmpackc.low %vm158_vm1, %vm1266_vm4  ;;  %v304_v53 = vld [vmem:[%s1602_s3] sm:$0xff]  ;;  %v306_v55 = vld [vmem:[%s1602_s3 + $0x10] sm:$0xff] }
  0x18   :  { %v72_v19 = vsel %vm68_vm0, %v67_v8, %v64_v9  ;;  %v88_v22 = vsel %vm85_vm2, %v81_v10, %v82_v13  ;;  %v87_v23 = vsel %vm85_vm2, %v82_v13, %v83_v15  ;;  %100 = vrot.lane.b32.xlu0 %v48_v7, %s1265_s28  ;;  %v69_v24 = vsel %vm68_vm0, %v66_v14, %v67_v8  ;;  %v307_v57 = vld [vmem:[%s1602_s3 + $0x18] sm:$0xff]  ;;  %v308_v59 = vld [vmem:[%s1602_s3 + $0x20] sm:$0xff]  ;;  %v309_v60 = vld [vmem:[%s1602_s3 + $0x28] sm:$0xff]  ;;  %s1267_s1 = smov 32   ;;  %s1272_s23 = smov [#allocation8]  }
  0x19   :  { %v57_v3 = vand.u32 15, %v1339_v2  ;;  %v59_v18 = vand.u32 15, %v55_v4  ;;  %114 = vrot.lane.b32.xlu1 %v88_v22, %s1264_s20  ;;  %v71_v25 = vsel %vm68_vm0, %v64_v9, %v65_v12  ;;  %v1101_v27 = vpack.c.bf16 %v137_v21, %v136_v20  ;;  %v310_v62 = vld [vmem:[%s1602_s3 + $0x30] sm:$0xff]  ;;  %v311_v63 = vld [vmem:[%s1602_s3 + $0x38] sm:$0xff]  ;;  %v312_v9 = vld [vmem:[%s1602_s3 + $0x40] sm:$0xff]  ;;  %s856_s24 = sshll.u32 %s1272_s23, 4  ;;  %s857_s24 = int_to_ptr.vmem [resolvable:$true] %s856_s24 }
  0x1a   :  { %v70_v28 = vsel %vm68_vm0, %v65_v12, %v66_v14  ;;  %v89_v29 = vsel %vm85_vm2, %v84_v16, %v81_v10  ;;  %v86_v30 = vsel %vm85_vm2, %v83_v15, %v84_v16  ;;  %v56_v32 = vand.u32 15, %v1336_v1  ;;  %v313_v10 = vld [vmem:[%s1602_s3 + $0x48] sm:$0xff]  ;;  %v314_v17 = vld [vmem:[%s1602_s3 + $0x50] sm:$0xff]  ;;  %s1236_s25 = scalar_lea.vmem %s857_s24, 32  ;;  %p1241_p9 = scmp.lt.s32.totalorder %s857_s24, %s857_s24 }
  0x1b   :  { %vm1359_vm3 = vcmp.lt.s32.totalorder %v57_v3, 15  ;;  %vm80_vm6 = vcmp.lt.s32.totalorder %v59_v18, 15  ;;  %1103 = vmatprep.subr.msk.bf16.mxu1 %vm1102_vm5, %v1101_v27  ;;  %v54_v33 = vadd.s32 16, %v1336_v1  ;;  %vm145_vm10 = vcmask 97280   ;;  %v865_v3 = vld [vmem:[%s1601_s2] ss:$0 sm:$0xff]  ;;  %p1237_p8 = scmp.ne.s32.totalorder %s857_s24, %s1236_s25  ;;  %p1242_p10 = scmp.lt.s32.totalorder %s1236_s25, %s1236_s25 }
  0x1c   :  { %v91_v26 = vsel %vm1359_vm3, %v87_v23, 0.0  ;;  %102 = vrot.lane.b32.xlu0 %v49_v11, %s1265_s28  ;;  %v93_v31 = vsel %vm80_vm6, %v89_v29, 0.0  ;;  %1106 = vmatpush3.bf16.msk.msra.mxu1 %vm1102_vm5, %v1101_v27  ;;  %vm60_vm7 = vcmp.gt.s32.totalorder %v56_v32, 0  ;;  %v1107_v56 = vpack.c.bf16 %v305_v54, %v304_v53  ;;  %v315_v18 = vld [vmem:[%s1602_s3 + $0x58] sm:$0xff]  ;;  %s1268_s3 = smov 64   ;;  %v426_v53 = vld [vmem:[#allocation5 + $0x48] sm:$0xff] }
  0x1d   :  { %116 = vrot.lane.b32.xlu1 %v91_v26, %s1264_s20  ;;  %v73_v36 = vsel %vm60_vm7, %v72_v19, 0.0  ;;  %v58_v37 = vand.u32 15, %v54_v33  ;;  %v1111_v58 = vpack.c.bf16 %v307_v57, %v306_v55  ;;  %v1115_v61 = vpack.c.bf16 %v309_v60, %v308_v59  ;;  %v428_v57 = vld [vmem:[#allocation5 + $0x58] sm:$0xff]  ;;  %v429_v59 = vld [vmem:[#allocation5 + $0x60] sm:$0xff]  ;;  %v430_v60 = vld [vmem:[#allocation5 + $0x68] sm:$0xff]  ;;  %p1243_p11 = por %p1242_p10, %p1241_p9 }
  0x1e   :  { %1108 = vmatprep.subr.bf16.mxu1 %v1107_v56  ;;  %v1119_v0 = vpack.c.bf16 %v311_v63, %v310_v62  ;;  %vm251_vm12 = vcmask 261120   ;;  %v1123_v12 = vpack.c.bf16 %v313_v10, %v312_v9  ;;  %v1127_v20 = vpack.c.bf16 %v315_v18, %v314_v17  ;;  %v431_v62 = vld [vmem:[#allocation5 + $0x70] sm:$0xff]  ;;  %v432_v63 = vld [vmem:[#allocation5 + $0x78] sm:$0xff] }
  0x1f   :  { %vm62_vm11 = vcmp.gt.s32.totalorder %v58_v37, 0  ;;  %v265_v26 = vand.u32 7, %v1336_v1  ;;  %vm323_vm3 = vcmask 785408   ;;  %v1269_v55 = vmov 0.0|0.0   ;;  %v417_v17 = vld [vmem:[#allocation5 + $0x10] sm:$0xff]  ;;  %v418_v18 = vld [vmem:[#allocation5 + $0x18] sm:$0xff]  ;;  %p1244_p12 = pnand %p1243_p11, %p1237_p8 }
  0x20   :  { %118 = vrot.lane.b32.xlu0 %v86_v30, %s1264_s20  ;;  %v75_v45 = vsel %vm62_vm11, %v70_v28, 0.0  ;;  %1131 = vmatprep.subr.bf16.mxu0 %v1269_v55  ;;  %v583_v30 = vld [vmem:[#allocation5 + $0x90] sm:$0xff] }
  0x21   :  { %120 = vrot.lane.b32.xlu1 %v93_v31, %s1264_s20  ;;  %vm1457_vm14 = vcmp.lt.s32.totalorder %v265_v26, 7  ;;  %vm1461_vm15 = vcmp.gt.s32.totalorder %v265_v26, 0  ;;  %v584_v31 = vld [vmem:[#allocation5 + $0x98] sm:$0xff] }
  0x22   :  { %v1159_v33 = vpack.c.bf16 %v584_v31, %v583_v30 }
  0x86   :  { %v105_v34 = vpop.permute.xlu1 %104  ;;  %v99_v35 = vpop.permute.xlu0 %98 }
  0x87   :  { %v127_v38 = vsel %vm126_vm8, %v73_v36, %v99_v35  ;;  %v130_v47 = vsel %vm126_vm8, %v69_v24, %v105_v34 }
  0x8a   :  { %v101_v39 = vpop.permute.xlu0 %100 }
  0x8b   :  { %v115_v40 = vpop.permute.xlu1 %114  ;;  %v128_v42 = vsel %vm126_vm8, %v71_v25, %v101_v39  ;;  %v266_v25 = vand.u32 7, %v1339_v2 }
  0x8c   :  { %v132_v41 = vsel %vm131_vm9, %v127_v38, %v115_v40 }
  0x8d   :  { %957 = vmatprep.mubr.msk.f32.mxu1 %vm145_vm10, %v132_v41  ;;  %vm1453_vm13 = vcmp.lt.s32.totalorder %v266_v25, 7  ;;  %vm1465_vm1 = vcmp.gt.s32.totalorder %v266_v25, 0  ;;  %v422_v25 = vld [vmem:[#allocation5 + $0x38] sm:$0xff] }
  0x8e   :  { %v103_v43 = vpop.permute.xlu0 %102 }
  0x8f   :  { %v117_v44 = vpop.permute.xlu1 %116  ;;  %v129_v48 = vsel %vm126_vm8, %v75_v45, %v103_v43 }
  0x90   :  { %v133_v46 = vsel %vm131_vm9, %v128_v42, %v117_v44 }
  0x91   :  { %958 = vmatmul.mubr.msk.f32.vlgmr.msra.gmra.mrb[0].mxu1 %vm145_vm10, %v133_v46 }
  0x92   :  { %v119_v49 = vpop.permute.xlu0 %118  ;;  %1110 = vmatpush3.bf16.msra.mxu1 %v1107_v56  ;;  %v427_v56 = vld [vmem:[#allocation5 + $0x50] sm:$0xff] }
  0x93   :  { %v121_v50 = vpop.permute.xlu1 %120  ;;  %v134_v51 = vsel %vm131_vm9, %v129_v48, %v119_v49  ;;  %1112 = vmatprep.subr.bf16.mxu1 %v1111_v58 }
  0x94   :  { %v135_v52 = vsel %vm131_vm9, %v130_v47, %v121_v50  ;;  %960 = vmatprep.mubr.msk.f32.mxu1 %vm145_vm10, %v134_v51 }
  0x95   :  { %961 = vmatmul.mubr.msk.f32.gmra.mrb[2].mxu1 %vm145_vm10, %v135_v52  ;;  %v425_v52 = vld [vmem:[#allocation5 + $0x40] sm:$0xff] }
  0x96   :  { %1114 = vmatpush3.bf16.msra.mxu1 %v1111_v58  ;;  %v1132_v54 = vpack.c.bf16 %v426_v53, %v425_v52  ;;  %v1135_v58 = vpack.c.bf16 %v428_v57, %v427_v56  ;;  %v756_v52 = vld [vmem:[%s1606_s7] sm:$0xff]  ;;  %v757_v53 = vld [vmem:[%s1606_s7 + $0x8] sm:$0xff]  ;;  %v759_v57 = vld [vmem:[%s1606_s7 + $0x18] sm:$0xff] }
  0x97   :  { %1116 = vmatprep.subr.bf16.mxu1 %v1115_v61  ;;  %v1180_v56 = vpack.c.bf16 %v757_v53, %v756_v52 }
  0x98   :  { %1133 = vmatpush3.bf16.msra.mxu0 %v1132_v54  ;;  %v758_v54 = vld [vmem:[%s1606_s7 + $0x10] sm:$0xff] }
  0x99   :  { %1134 = vmatprep.subr.bf16.mxu0 %v1269_v55 }
  0x9a   :  { %1118 = vmatpush3.bf16.msra.mxu1 %v1115_v61  ;;  %v1138_v61 = vpack.c.bf16 %v430_v60, %v429_v59  ;;  %v760_v59 = vld [vmem:[%s1606_s7 + $0x20] sm:$0xff]  ;;  %v761_v60 = vld [vmem:[%s1606_s7 + $0x28] sm:$0xff] }
  0x9b   :  { %1120 = vmatprep.subr.bf16.mxu1 %v1119_v0 }
  0x9c   :  { %1136 = vmatpush3.bf16.msra.mxu0 %v1135_v58  ;;  %v1183_v58 = vpack.c.bf16 %v759_v57, %v758_v54 }
  0x9d   :  { %1137 = vmatprep.subr.bf16.mxu0 %v1269_v55 }
  0x9e   :  { %1122 = vmatpush3.bf16.msra.mxu1 %v1119_v0  ;;  %v1141_v0 = vpack.c.bf16 %v432_v63, %v431_v62  ;;  %v762_v62 = vld [vmem:[%s1606_s7 + $0x30] sm:$0xff]  ;;  %v763_v63 = vld [vmem:[%s1606_s7 + $0x38] sm:$0xff] }
  0x9f   :  { %1124 = vmatprep.subr.bf16.mxu1 %v1123_v12 }
  0xa0   :  { %1139 = vmatpush3.bf16.msra.mxu0 %v1138_v61  ;;  %v1186_v61 = vpack.c.bf16 %v761_v60, %v760_v59 }
  0xa1   :  { %1140 = vmatprep.subr.bf16.mxu0 %v1269_v55 }
  0xa2   :  { %1126 = vmatpush3.bf16.msra.mxu1 %v1123_v12 }
  0xa3   :  { %1128 = vmatprep.subr.bf16.mxu1 %v1127_v20 }
  0xa4   :  { %1142 = vmatpush3.bf16.msra.mxu0 %v1141_v0  ;;  %v764_v0 = vld [vmem:[%s1606_s7 + $0x40] sm:$0xff] }
  0xa5   :  { %1143 = vmatprep.subr.bf16.mxu0 %v1269_v55 }
  0xa6   :  { %1130 = vmatpush3.bf16.msra.mxu1 %v1127_v20  ;;  %v1147_v20 = vpack.c.bf16 %v418_v18, %v417_v17 }
  0xa7   :  { %1179 = vmatprep.subr.bf16.mxu1 %v1269_v55 }
 0x164   :  { %v959_v4 = vpop.f32.mrb[0].mxu1 }
 0x165   :  { %v234_v5 = vadd.f32 %v959_v4, %v865_v3  ;;  %v228_v6 = vpop.f32.mrb[1].mxu1  ;;  %v871_v4 = vld [vmem:[%s1603_s4] ss:$0 sm:$0xff] }
 0x166   :  { %v229_v7 = vadd.f32 %v865_v3, %v228_v6 }
 0x167   :  { %v248_v8 = vmax.f32 %v234_v5, 0.0 }
 0x168   :  { %v247_v11 = vmax.f32 %v229_v7, 0.0  ;;  %v962_v13 = vpop.f32.mrb[2].mxu1 }
 0x169   :  { %253 = vst.msk [vmem:[#allocation2 + $0x8] sm:$0xff] %vm251_vm12, %v248_v8  ;;  %v244_v14 = vadd.f32 %v962_v13, %v865_v3  ;;  %v238_v15 = vpop.f32.mrb[3].mxu1 }
 0x16a   :  { %252 = vst.msk [vmem:[#allocation2] sm:$0xff] %vm251_vm12, %v247_v11  ;;  %v239_v16 = vadd.f32 %v865_v3, %v238_v15  ;;  %v1271_v3 = vmov 0.0   ;;  %v416_v15 = vld [vmem:[#allocation5 + $0x8] sm:$0xff] }
 0x16b   :  { %v250_v19 = vmax.f32 %v244_v14, 0.0  ;;  %v415_v14 = vld [vmem:[#allocation5] sm:$0xff] }
 0x16c   :  { %v249_v21 = vmax.f32 %v239_v16, 0.0  ;;  %v1144_v16 = vpack.c.bf16 %v416_v15, %v415_v14 }
 0x16d   :  { %255 = vst.msk [vmem:[#allocation2 + $0x18] sm:$0xff] %vm251_vm12, %v250_v19 }
 0x16e   :  { %254 = vst.msk [vmem:[#allocation2 + $0x10] sm:$0xff] %vm251_vm12, %v249_v21  ;;  %v419_v21 = vld [vmem:[#allocation5 + $0x20] sm:$0xff] }
 0x171   :  { %v256_v22 = vld [vmem:[#allocation2] ss:$2 sm:$0xff]  ;;  %v260_v23 = vld [vmem:[#allocation2 + $0x1] ss:$2 sm:$0xff] }
 0x172   :  { %v263_v24 = vmax.f32 %v256_v22, %v260_v23  ;;  %v420_v22 = vld [vmem:[#allocation5 + $0x28] sm:$0xff] }
 0x173   :  { %v1150_v23 = vpack.c.bf16 %v420_v22, %v419_v21 }
 0x174   :  { %285 = vrot.lane.b32.xlu0 %v263_v24, %s1267_s1  ;;  %v269_v2 = vrot.slane %v263_v24, 7  ;;  %v277_v35 = vrot.slane %v263_v24, 1  ;;  %v421_v24 = vld [vmem:[#allocation5 + $0x30] sm:$0xff] }
 0x175   :  { %v258_v27 = vld [vmem:[#allocation2 + $0x10] ss:$2 sm:$0xff]  ;;  %v262_v28 = vld [vmem:[#allocation2 + $0x11] ss:$2 sm:$0xff]  ;;  %v1153_v26 = vpack.c.bf16 %v422_v25, %v421_v24 }
 0x176   :  { %v264_v29 = vmax.f32 %v258_v27, %v262_v28  ;;  %v581_v27 = vld [vmem:[#allocation5 + $0x80] sm:$0xff]  ;;  %v582_v28 = vld [vmem:[#allocation5 + $0x88] sm:$0xff] }
 0x178   :  { %287 = vrot.lane.b32.xlu1 %v264_v29, %s1267_s1  ;;  %v270_v34 = vrot.slane %v264_v29, 7  ;;  %v278_v36 = vrot.slane %v264_v29, 1  ;;  %v1156_v29 = vpack.c.bf16 %v582_v28, %v581_v27  ;;  %v879_v28 = vld [vmem:[%s1607_s8] ss:$0 sm:$0xff] }
 0x17a   :  { %v280_v37 = vsel %vm85_vm2, %v278_v36, %v277_v35  ;;  %v279_v38 = vsel %vm85_vm2, %v277_v35, %v278_v36  ;;  %v272_v39 = vsel %vm68_vm0, %v270_v34, %v269_v2  ;;  %v271_v40 = vsel %vm68_vm0, %v269_v2, %v270_v34  ;;  %v585_v2 = vld [vmem:[#allocation5 + $0xa0] sm:$0xff]  ;;  %v586_v34 = vld [vmem:[#allocation5 + $0xa8] sm:$0xff]  ;;  %v587_v36 = vld [vmem:[#allocation5 + $0xb0] sm:$0xff] }
 0x17b   :  { %v282_v41 = vsel %vm1453_vm13, %v280_v37, 0.0  ;;  %v281_v42 = vsel %vm1457_vm14, %v279_v38, 0.0  ;;  %v273_v43 = vsel %vm1461_vm15, %v272_v39, 0.0  ;;  %v274_v44 = vsel %vm1465_vm1, %v271_v40, 0.0  ;;  %v588_v37 = vld [vmem:[#allocation5 + $0xb8] sm:$0xff]  ;;  %v665_v39 = vld [vmem:[#allocation5 + $0xc0] sm:$0xff] }
 0x17c   :  { %295 = vrot.lane.b32.xlu1 %v282_v41, %s1268_s3  ;;  %293 = vrot.lane.b32.xlu0 %v281_v42, %s1268_s3  ;;  %vm301_vm2 = vcmask 523264   ;;  %vm1270_vm0 = vmmov 0   ;;  %v1162_v35 = vpack.c.bf16 %v586_v34, %v585_v2  ;;  %v1165_v38 = vpack.c.bf16 %v588_v37, %v587_v36  ;;  %v666_v40 = vld [vmem:[#allocation5 + $0xc8] sm:$0xff]  ;;  %v667_v42 = vld [vmem:[#allocation5 + $0xd0] sm:$0xff] }
 0x17d   :  { %1006 = vmatprep.mubr.msk.f32.mxu0 %vm1270_vm0, %v1271_v3  ;;  %v1168_v41 = vpack.c.bf16 %v666_v40, %v665_v39 }
 0x1e6   :  { %v286_v45 = vpop.permute.xlu0 %285 }
 0x1e7   :  { %v299_v1 = vsel %vm251_vm12, %v273_v43, %v286_v45  ;;  %v668_v43 = vld [vmem:[#allocation5 + $0xd8] sm:$0xff] }
 0x1e8   :  { %v1171_v45 = vpack.c.bf16 %v668_v43, %v667_v42 }
 0x1ea   :  { %v288_v46 = vpop.permute.xlu1 %287 }
 0x1eb   :  { %v300_v47 = vsel %vm251_vm12, %v274_v44, %v288_v46  ;;  %v669_v46 = vld [vmem:[#allocation5 + $0xe0] sm:$0xff] }
 0x1ee   :  { %v296_v48 = vpop.permute.xlu1 %295  ;;  %v294_v49 = vpop.permute.xlu0 %293 }
 0x1ef   :  { %v303_v50 = vsel %vm301_vm2, %v300_v47, %v296_v48  ;;  %v302_v51 = vsel %vm301_vm2, %v299_v1, %v294_v49  ;;  %v670_v1 = vld [vmem:[#allocation5 + $0xe8] sm:$0xff]  ;;  %v671_v48 = vld [vmem:[#allocation5 + $0xf0] sm:$0xff]  ;;  %v672_v49 = vld [vmem:[#allocation5 + $0xf8] sm:$0xff] }
 0x1f0   :  { %987 = vmatprep.mubr.msk.f32.mxu1 %vm323_vm3, %v302_v51  ;;  %v1174_v47 = vpack.c.bf16 %v670_v1, %v669_v46 }
 0x1f1   :  { %988 = vmatmul.mubr.msk.f32.vlgmr.msra.gmra.mrb[4].mxu1 %vm323_vm3, %v303_v50  ;;  %v1177_v50 = vpack.c.bf16 %v672_v49, %v671_v48 }
 0x1f2   :  { %1098 = vmatprep.mubr.msk.f32.mxu1 %vm1270_vm0, %v1271_v3  ;;  %1181 = vmatpush3.bf16.msra.mxu1 %v1180_v56 }
 0x1f3   :  { %1182 = vmatprep.subr.bf16.mxu1 %v1269_v55 }
 0x1f6   :  { %1184 = vmatpush3.bf16.msra.mxu1 %v1183_v58 }
 0x1f7   :  { %1185 = vmatprep.subr.bf16.mxu1 %v1269_v55 }
 0x1fa   :  { %1187 = vmatpush3.bf16.msra.mxu1 %v1186_v61 }
 0x1fb   :  { %1188 = vmatprep.subr.bf16.mxu1 %v1269_v55 }
 0x2c4   :  { %v989_v5 = vpop.f32.mrb[4].mxu1 }
 0x2c5   :  { %v402_v6 = vadd.f32 %v989_v5, %v871_v4  ;;  %v396_v7 = vpop.f32.mrb[5].mxu1 }
 0x2c6   :  { %v397_v8 = vadd.f32 %v871_v4, %v396_v7  ;;  %v765_v4 = vld [vmem:[%s1606_s7 + $0x48] sm:$0xff]  ;;  %v767_v7 = vld [vmem:[%s1606_s7 + $0x58] sm:$0xff] }
 0x2c7   :  { %v406_v9 = vmax.f32 %v402_v6, 0.0  ;;  %v1192_v5 = vpack.c.bf16 %v765_v4, %v764_v0  ;;  %v766_v6 = vld [vmem:[%s1606_s7 + $0x50] sm:$0xff] }
 0x2c8   :  { %v405_v10 = vmax.f32 %v397_v8, 0.0  ;;  %v1195_v8 = vpack.c.bf16 %v767_v7, %v766_v6 }
 0x2c9   :  { %408 = vst.msk [vmem:[#allocation3 + $0x8] sm:$0xff] %vm301_vm2, %v406_v9  ;;  %v768_v9 = vld [vmem:[%s1606_s7 + $0x60] sm:$0xff] }
 0x2ca   :  { %407 = vst.msk [vmem:[#allocation3] sm:$0xff] %vm301_vm2, %v405_v10  ;;  %v769_v10 = vld [vmem:[%s1606_s7 + $0x68] sm:$0xff] }
 0x2d1   :  { %v409_v11 = vld [vmem:[#allocation3] ss:$2 sm:$0xff]  ;;  %v411_v12 = vld [vmem:[#allocation3 + $0x1] ss:$2 sm:$0xff] }
 0x2d2   :  { %v412_v13 = vmax.f32 %v409_v11, %v411_v12  ;;  %v1198_v11 = vpack.c.bf16 %v769_v10, %v768_v9  ;;  %v770_v12 = vld [vmem:[%s1606_s7 + $0x70] sm:$0xff] }
 0x2d4   :  { %413 = vst.msk [vmem:[#allocation4] sm:$0xff] %vm301_vm2, %v412_v13  ;;  %v771_v13 = vld [vmem:[%s1606_s7 + $0x78] sm:$0xff] }
 0x2d5   :  { %v1201_v14 = vpack.c.bf16 %v771_v13, %v770_v12 }
 0x2db   :  { %v424_v19 = vld [vmem:[#allocation4 + $0x1] ss:$4 sm:$0x3]  ;;  %v414_v32 = vld [vmem:[#allocation4] ss:$4 sm:$0x3] }
 0x2dc   :  { %1007 = vmatmul.mubr.msk.f32.vlgmr.msra.gmra.mrb[0].mxu0 %vm301_vm2, %v424_v19  ;;  %v580_v44 = vld [vmem:[#allocation4 + $0x2] ss:$4 sm:$0x3]  ;;  %v664_v51 = vld [vmem:[#allocation4 + $0x3] ss:$4 sm:$0x3] }
 0x2dd   :  { %1145 = vmatpush3.bf16.msra.mxu0 %v1144_v16  ;;  %1025 = vmatprep.mubr.msk.f32.mxu0 %vm1270_vm0, %v1271_v3 }
 0x2de   :  { %1146 = vmatprep.subr.bf16.mxu0 %v1269_v55 }
 0x2e1   :  { %1148 = vmatpush3.bf16.msra.mxu0 %v1147_v20 }
 0x2e2   :  { %1149 = vmatprep.subr.bf16.mxu0 %v1269_v55 }
 0x2e5   :  { %1151 = vmatpush3.bf16.msra.mxu0 %v1150_v23 }
 0x2e6   :  { %1152 = vmatprep.subr.bf16.mxu0 %v1269_v55 }
 0x2e9   :  { %1154 = vmatpush3.bf16.msra.mxu0 %v1153_v26 }
 0x2ea   :  { %1155 = vmatprep.subr.bf16.mxu0 %v1269_v55 }
 0x2ec   :  { %1026 = vmatmul.mubr.msk.f32.vlgmr.msra.gmra.mrb[2].mxu0 %vm301_vm2, %v414_v32 }
 0x2ed   :  { %1157 = vmatpush3.bf16.msra.mxu0 %v1156_v29  ;;  %1044 = vmatprep.mubr.msk.f32.mxu0 %vm1270_vm0, %v1271_v3 }
 0x2ee   :  { %1158 = vmatprep.subr.bf16.mxu0 %v1269_v55 }
 0x2f1   :  { %1160 = vmatpush3.bf16.msra.mxu0 %v1159_v33 }
 0x2f2   :  { %1161 = vmatprep.subr.bf16.mxu0 %v1269_v55 }
 0x2f5   :  { %1163 = vmatpush3.bf16.msra.mxu0 %v1162_v35 }
 0x2f6   :  { %1164 = vmatprep.subr.bf16.mxu0 %v1269_v55 }
 0x2f9   :  { %1166 = vmatpush3.bf16.msra.mxu0 %v1165_v38 }
 0x2fa   :  { %1167 = vmatprep.subr.bf16.mxu0 %v1269_v55 }
 0x2fc   :  { %1045 = vmatmul.mubr.msk.f32.vlgmr.msra.gmra.mrb[4].mxu0 %vm301_vm2, %v580_v44 }
 0x2fd   :  { %1169 = vmatpush3.bf16.msra.mxu0 %v1168_v41  ;;  %1063 = vmatprep.mubr.msk.f32.mxu0 %vm1270_vm0, %v1271_v3  ;;  %v1189_v3 = vpack.c.bf16 %v763_v63, %v762_v62 }
 0x2fe   :  { %1170 = vmatprep.subr.bf16.mxu0 %v1269_v55 }
 0x2ff   :  { %1190 = vmatpush3.bf16.msra.mxu1 %v1189_v3 }
 0x300   :  { %1191 = vmatprep.subr.bf16.mxu1 %v1269_v55 }
 0x301   :  { %1172 = vmatpush3.bf16.msra.mxu0 %v1171_v45 }
 0x302   :  { %1173 = vmatprep.subr.bf16.mxu0 %v1269_v55 }
 0x303   :  { %1193 = vmatpush3.bf16.msra.mxu1 %v1192_v5 }
 0x304   :  { %1194 = vmatprep.subr.bf16.mxu1 %v1269_v55 }
 0x305   :  { %1175 = vmatpush3.bf16.msra.mxu0 %v1174_v47 }
 0x306   :  { %1176 = vmatprep.subr.bf16.mxu0 %v1269_v55 }
 0x307   :  { %1196 = vmatpush3.bf16.msra.mxu1 %v1195_v8 }
 0x308   :  { %1197 = vmatprep.subr.bf16.mxu1 %v1269_v55 }
 0x309   :  { %1178 = vmatpush3.bf16.msra.mxu0 %v1177_v50 }
 0x30b   :  { %1199 = vmatpush3.bf16.msra.mxu1 %v1198_v11 }
 0x30c   :  { %1064 = vmatmul.mubr.msk.f32.vlgmr.msra.gmra.mrb[6].mxu0 %vm301_vm2, %v664_v51  ;;  %1200 = vmatprep.subr.bf16.mxu1 %v1269_v55  ;;  %v878_v55 = vld [vmem:[%s1605_s6] ss:$0 sm:$0xff] }
 0x30f   :  { %1202 = vmatpush3.bf16.msra.mxu1 %v1201_v14 }
 0x3af   :  { %v502_v15 = vpop.f32.mrb[0].mxu0 }
 0x3b0   :  { %v1008_v16 = vpop.f32.mrb[1].mxu0 }
 0x3bf   :  { %v575_v17 = vpop.f32.mrb[2].mxu0 }
 0x3c0   :  { %v576_v18 = vadd.f32 %v575_v17, %v502_v15  ;;  %v1027_v19 = vpop.f32.mrb[3].mxu0 }
 0x3cf   :  { %v658_v20 = vpop.f32.mrb[4].mxu0 }
 0x3d0   :  { %v662_v21 = vadd.f32 %v658_v20, %v576_v18  ;;  %v1046_v22 = vpop.f32.mrb[5].mxu0 }
 0x3df   :  { %v742_v23 = vpop.f32.mrb[6].mxu0 }
 0x3e0   :  { %v746_v24 = vadd.f32 %v742_v23, %v662_v21  ;;  %v1065_v25 = vpop.f32.mrb[7].mxu0 }
 0x3e2   :  { %v754_v26 = vadd.f32 %v878_v55, %v746_v24 }
 0x3e4   :  { %v755_v27 = vmax.f32 %v754_v26, 0.0 }
 0x3e6   :  { %1099 = vmatmul.mubr.f32.vlgmr.msra.gmra.mrb[6].mxu1 %v755_v27 }
 0x4b9   :  { %v845_v29 = vpop.f32.mrb[6].mxu1 }
 0x4ba   :  { %v846_v30 = vadd.f32 %v879_v28, %v845_v29  ;;  %v1100_v31 = vpop.f32.mrb[7].mxu1 }
 0x4bc   :  { %849 = vst [vmem:[#allocation8] sm:$0x3] %v846_v30 }
 0x4bd   :  { %1247 = shalt.err (!%p1244_p12)
}
 0x4be   :  { %s1248_s5 = scalar_lea.hbm %s1608_s9, 32 }
 0x4bf   :  { %p1249_p13 = scmp.ne.s32.totalorder %s1608_s9, %s1248_s5  ;;  %p1252_p0 = scmp.lt.u32.totalorder %s1248_s5, %s1608_s9 }
 0x4c1   :  { %p1254_p1 = pnand %p1252_p0, %p1249_p13 }
 0x4c3   :  { %1257 = shalt.err (!%p1254_p1)
}
 0x4c4   :  { %859 = dma.vmem_to_hbm [thread:$0]  %s857_s24, 32, %s1608_s9, [#allocation7]  }
 0x4c5   :  { %1260 = dma.done.wait [#allocation7], 32  }
 0x4c6   :  { %1261 = vsyncadd [#allocation7], 4294967264 }
 0x4c7   :  { %863 = vsyncpa [#allocation6], 1 }
 0x4c8   :  { %864 = vsyncpa [#allocation7], 1 }

</bundles_post_ra>
